<compile_context>
chip_gen: v7x
topology: tpu7x:2x2x1
jax: 0.10.0
libtpu: 0.0.40
codegen_flags: <defaults>
</compile_context>

<pallas_src>
import jax
import jax.numpy as jnp
from jax import lax
from jax.experimental import pallas as pl
from jax.experimental.pallas import tpu as pltpu

FEATURES = 10          # len(['H','R','OPS','RBI','SLG','HR','BA','PA','OBP','AB'])
HIDDEN = (32, 16, 8)   # fc1, fc2, fc3 output sizes
OUT = 1                # fc4 output size
_LANE = 128


def _mlp_kernel(x_ref,
                w1_ref, b1_ref,
                w2_ref, b2_ref,
                w3_ref, b3_ref,
                w4_ref, b4_ref,
                o_ref):
    """relu(fc1) -> relu(fc2) -> relu(fc3) -> fc4; batch lives on the lane axis."""
    # x_ref: (tb, FEATURES) in the caller's dtype (bf16 recommended).
    # Layer 1 contracts the feature axis of BOTH operands (transposed-rhs
    # matmul) so the batch lands directly on the lane axis of the result --
    # no wrapper transpose and no in-kernel relayout of the big operand.
    h = lax.dot_general(w1_ref[...], x_ref[...],
                        dimension_numbers=(((1,), (1,)), ((), ())),
                        preferred_element_type=jnp.float32)
    h = jnp.maximum(h + b1_ref[...], 0.0)                              # (32, tb)

    h = jnp.dot(w2_ref[...], h, preferred_element_type=jnp.float32)
    h = jnp.maximum(h + b2_ref[...], 0.0)                              # (16, tb)

    h = jnp.dot(w3_ref[...], h, preferred_element_type=jnp.float32)
    h = jnp.maximum(h + b3_ref[...], 0.0)                              # (8, tb)

    h = jnp.dot(w4_ref[...], h, preferred_element_type=jnp.float32)
    o_ref[...] = (h + b4_ref[...]).astype(o_ref.dtype)                 # (1, tb) lane-dense


def _pick_tile(batch, tile_b):
    """Lane-aligned batch tile.

    Small batches -> single grid step (no pipeline prologue; best on 1-TC
    v5e/v6e).  When the batch does split, keep the step count EVEN so v7x's
    two TensorCores (which shard the 'parallel' grid axis) get equal work.
    """
    b_ceil = pl.cdiv(batch, _LANE) * _LANE          # batch rounded up to 128
    tb = max(_LANE, (int(tile_b) // _LANE) * _LANE)
    tb = min(tb, b_ceil)
    steps = pl.cdiv(b_ceil, tb)
    if steps > 1 and steps % 2 == 1:
        even_steps = steps + 1
        tb2 = max(_LANE, pl.cdiv(pl.cdiv(b_ceil, even_steps), _LANE) * _LANE)
        if pl.cdiv(b_ceil, tb2) % 2 == 0:           # best-effort parity fix
            tb = tb2
    return tb


def mlp_forward(x, params, *, tile_b=32768):
    """x: (B, FEATURES), bf16 recommended (f32 also works).
    params: PyTorch-layout weights w{i}: (out, in) f32, biases b{i}: (out, 1) f32.
    Returns (B, 1) float32."""
    B, F = x.shape
    assert F == FEATURES

    # Match layer-1 weight dtype to x so the first matmul is a single-dtype
    # MXU op (bf16 x bf16 -> f32 accumulate).  Weight is ~1 KB; cast is free.
    w1 = params["w1"].astype(x.dtype)
    b1 = params["b1"]
    w2, b2 = params["w2"], params["b2"]
    w3, b3 = params["w3"], params["b3"]
    w4, b4 = params["w4"], params["b4"]

    tb = _pick_tile(B, tile_b)
    steps = pl.cdiv(B, tb)
    b_cov = steps * tb          # lanes covered by the grid (>= B)

    # Weights/biases are ~3 KB total -> single full-array blocks with a
    # constant index_map: VMEM-resident across all grid steps.
    full = lambda shape: pl.BlockSpec(shape, lambda i: (0, 0))

    out_t = pl.pallas_call(
        _mlp_kernel,
        # Output dtype pinned to f32 (independent of x's dtype).
        out_shape=jax.ShapeDtypeStruct((OUT, b_cov), jnp.float32),
        grid_spec=pl.GridSpec(
            grid=(steps,),
            in_specs=[
                # x consumed in its native row-major (B, FEATURES) layout;
                # the trailing partial block (rows >= B) is padded by Pallas
                # and its garbage columns are sliced off below.
                pl.BlockSpec((tb, FEATURES), lambda i: (i, 0)),
                full(w1.shape), full(b1.shape),
                full(w2.shape), full(b2.shape),
                full(w3.shape), full(b3.shape),
                full(w4.shape), full(b4.shape),
            ],
            out_specs=pl.BlockSpec((OUT, tb), lambda i: (0, i)),   # lane-dense
        ),
        compiler_params=pltpu.CompilerParams(
            dimension_semantics=("parallel",),
            # The (tb, 10) x tile is lane-padded 10->128 in VMEM, so budget
            # explicitly: 48 MiB clears the v5e 16-MiB / v7x 32-MiB scoped
            # defaults and stays inside v7x's 64-MiB physical VMEM.
            vmem_limit_bytes=48 * 1024 * 1024),
    )(x, w1, b1, w2, b2, w3, b3, w4, b4)

    # (1, b_cov) -> (B, 1); tiny, pure layout, done by XLA in the wrapper.
    return out_t[:, :B].T


def init_params(key):
    """PyTorch nn.Linear default init: U(-1/sqrt(fan_in), 1/sqrt(fan_in)).
    Weights stored in PyTorch layout (out, in); biases as (out, 1)."""
    dims = (FEATURES,) + HIDDEN + (OUT,)
    params = {}
    for li in range(4):
        fan_in, fan_out = dims[li], dims[li + 1]
        key, kw, kb = jax.random.split(key, 3)
        bound = 1.0 / jnp.sqrt(float(fan_in))
        params[f"w{li+1}"] = jax.random.uniform(
            kw, (fan_out, fan_in), jnp.float32, -bound, bound)
        params[f"b{li+1}"] = jax.random.uniform(
            kb, (fan_out, 1), jnp.float32, -bound, bound)
    return params


def _ref_forward(x, p):
    h = jnp.maximum(x @ p["w1"].T + p["b1"].T, 0.0)
    h = jnp.maximum(h @ p["w2"].T + p["b2"].T, 0.0)
    h = jnp.maximum(h @ p["w3"].T + p["b3"].T, 0.0)
    return h @ p["w4"].T + p["b4"].T


if __name__ == "__main__":
    key = jax.random.PRNGKey(0)
    kx, kp = jax.random.split(key)

    B = 300                                  # non-multiple of 128: exercises partial blocks
    # Producer emits bf16 directly (no standalone cast pass) -> halves the
    # dominant HBM stream into the kernel.
    x = jax.random.normal(kx, (B, FEATURES), jnp.bfloat16)
    params = init_params(kp)

    out = mlp_forward(x, params)
    out = jax.block_until_ready(out)

    ref = _ref_forward(x.astype(jnp.float32), params)
    assert out.shape == (B, OUT)
    assert out.dtype == jnp.float32
    # bf16 x / bf16 layer-1 weight vs f32 reference: loosen tolerance.
    assert jnp.allclose(out, ref, atol=3e-2, rtol=3e-2), (
        f"mismatch vs JAX reference (max abs err {jnp.max(jnp.abs(out - ref))})")

    print("KERNEL_OK")
</pallas_src>

<mosaic_0001>
module attributes {stable_mosaic.version = 11 : i64} {
  func.func @_mlp_kernel(%arg0: i32, %arg1: memref<384x10xbf16, #tpu.memory_space<vmem>>, %arg2: memref<32x10xbf16, #tpu.memory_space<vmem>>, %arg3: memref<32x1xf32, #tpu.memory_space<vmem>>, %arg4: memref<16x32xf32, #tpu.memory_space<vmem>>, %arg5: memref<16x1xf32, #tpu.memory_space<vmem>>, %arg6: memref<8x16xf32, #tpu.memory_space<vmem>>, %arg7: memref<8x1xf32, #tpu.memory_space<vmem>>, %arg8: memref<1x8xf32, #tpu.memory_space<vmem>>, %arg9: memref<1x1xf32, #tpu.memory_space<vmem>>, %arg10: memref<1x384xf32, #tpu.memory_space<vmem>>) attributes {dimension_semantics = [#tpu.dimension_semantics<parallel>], iteration_bounds = array<i64: 1>, scalar_prefetch = 0 : i64, scratch_operands = 0 : i64, tpu.core_type = #tpu.core_type<tc>, window_params = [{transform_indices = @transform_0, window_bounds = array<i64: 384, 10>}, {pipeline_mode = #tpu.pipeline_mode<synchronous>, transform_indices = @transform_1, window_bounds = array<i64: 32, 10>}, {pipeline_mode = #tpu.pipeline_mode<synchronous>, transform_indices = @transform_2, window_bounds = array<i64: 32, 1>}, {pipeline_mode = #tpu.pipeline_mode<synchronous>, transform_indices = @transform_3, window_bounds = array<i64: 16, 32>}, {pipeline_mode = #tpu.pipeline_mode<synchronous>, transform_indices = @transform_4, window_bounds = array<i64: 16, 1>}, {pipeline_mode = #tpu.pipeline_mode<synchronous>, transform_indices = @transform_5, window_bounds = array<i64: 8, 16>}, {pipeline_mode = #tpu.pipeline_mode<synchronous>, transform_indices = @transform_6, window_bounds = array<i64: 8, 1>}, {pipeline_mode = #tpu.pipeline_mode<synchronous>, transform_indices = @transform_7, window_bounds = array<i64: 1, 8>}, {pipeline_mode = #tpu.pipeline_mode<synchronous>, transform_indices = @transform_8, window_bounds = array<i64: 1, 1>}, {transform_indices = @transform_9, window_bounds = array<i64: 1, 384>}]} {
    %c0 = arith.constant 0 : index
    %c0_0 = arith.constant 0 : index
    %0 = vector.load %arg2[%c0, %c0_0] : memref<32x10xbf16, #tpu.memory_space<vmem>>, vector<32x10xbf16>
    %c0_1 = arith.constant 0 : index
    %c0_2 = arith.constant 0 : index
    %1 = vector.load %arg1[%c0_1, %c0_2] : memref<384x10xbf16, #tpu.memory_space<vmem>>, vector<384x10xbf16>
    %cst = arith.constant dense<0.000000e+00> : vector<32x384xf32>
    %2 = tpu.matmul %0, %1, %cst {dimension_numbers = #tpu.dot_dimension_numbers<[1], [1], [0], [0], [0, 0, 1, 0], [], []>} : vector<32x10xbf16>, vector<384x10xbf16>, vector<32x384xf32> -> vector<32x384xf32>
    %c0_3 = arith.constant 0 : index
    %c0_4 = arith.constant 0 : index
    %3 = vector.load %arg3[%c0_3, %c0_4] : memref<32x1xf32, #tpu.memory_space<vmem>>, vector<32x1xf32>
    %4 = vector.broadcast %3 : vector<32x1xf32> to vector<32x384xf32>
    %5 = arith.addf %2, %4 : vector<32x384xf32>
    %cst_5 = arith.constant 0.000000e+00 : f32
    %6 = vector.broadcast %cst_5 : f32 to vector<32x384xf32>
    %7 = arith.maximumf %5, %6 : vector<32x384xf32>
    %c0_6 = arith.constant 0 : index
    %c0_7 = arith.constant 0 : index
    %8 = vector.load %arg4[%c0_6, %c0_7] : memref<16x32xf32, #tpu.memory_space<vmem>>, vector<16x32xf32>
    %cst_8 = arith.constant dense<0.000000e+00> : vector<16x384xf32>
    %9 = tpu.matmul %8, %7, %cst_8 {dimension_numbers = #tpu.dot_dimension_numbers<[1], [0], [0], [1], [0, 0, 1, 1], [], []>} : vector<16x32xf32>, vector<32x384xf32>, vector<16x384xf32> -> vector<16x384xf32>
    %c0_9 = arith.constant 0 : index
    %c0_10 = arith.constant 0 : index
    %10 = vector.load %arg5[%c0_9, %c0_10] : memref<16x1xf32, #tpu.memory_space<vmem>>, vector<16x1xf32>
    %11 = vector.broadcast %10 : vector<16x1xf32> to vector<16x384xf32>
    %12 = arith.addf %9, %11 : vector<16x384xf32>
    %cst_11 = arith.constant 0.000000e+00 : f32
    %13 = vector.broadcast %cst_11 : f32 to vector<16x384xf32>
    %14 = arith.maximumf %12, %13 : vector<16x384xf32>
    %c0_12 = arith.constant 0 : index
    %c0_13 = arith.constant 0 : index
    %15 = vector.load %arg6[%c0_12, %c0_13] : memref<8x16xf32, #tpu.memory_space<vmem>>, vector<8x16xf32>
    %cst_14 = arith.constant dense<0.000000e+00> : vector<8x384xf32>
    %16 = tpu.matmul %15, %14, %cst_14 {dimension_numbers = #tpu.dot_dimension_numbers<[1], [0], [0], [1], [0, 0, 1, 1], [], []>} : vector<8x16xf32>, vector<16x384xf32>, vector<8x384xf32> -> vector<8x384xf32>
    %c0_15 = arith.constant 0 : index
    %c0_16 = arith.constant 0 : index
    %17 = vector.load %arg7[%c0_15, %c0_16] : memref<8x1xf32, #tpu.memory_space<vmem>>, vector<8x1xf32>
    %18 = vector.broadcast %17 : vector<8x1xf32> to vector<8x384xf32>
    %19 = arith.addf %16, %18 : vector<8x384xf32>
    %cst_17 = arith.constant 0.000000e+00 : f32
    %20 = vector.broadcast %cst_17 : f32 to vector<8x384xf32>
    %21 = arith.maximumf %19, %20 : vector<8x384xf32>
    %c0_18 = arith.constant 0 : index
    %c0_19 = arith.constant 0 : index
    %22 = vector.load %arg8[%c0_18, %c0_19] : memref<1x8xf32, #tpu.memory_space<vmem>>, vector<1x8xf32>
    %cst_20 = arith.constant dense<0.000000e+00> : vector<1x384xf32>
    %23 = tpu.matmul %22, %21, %cst_20 {dimension_numbers = #tpu.dot_dimension_numbers<[1], [0], [0], [1], [0, 0, 1, 1], [], []>} : vector<1x8xf32>, vector<8x384xf32>, vector<1x384xf32> -> vector<1x384xf32>
    %c0_21 = arith.constant 0 : index
    %c0_22 = arith.constant 0 : index
    %24 = vector.load %arg9[%c0_21, %c0_22] : memref<1x1xf32, #tpu.memory_space<vmem>>, vector<1x1xf32>
    %25 = vector.broadcast %24 : vector<1x1xf32> to vector<1x384xf32>
    %26 = arith.addf %23, %25 : vector<1x384xf32>
    %c0_23 = arith.constant 0 : index
    %c0_24 = arith.constant 0 : index
    %27 = vector.load %arg10[%c0_23, %c0_24] : memref<1x384xf32, #tpu.memory_space<vmem>>, vector<1x384xf32>
    tpu.vector_store %arg10[%c0_23, %c0_24], %26 {strides = array<i32>} : memref<1x384xf32, #tpu.memory_space<vmem>>, vector<1x384xf32>,
    return
  }
  func.func @transform_0(%arg0: i32) -> (i32, i32) {
    %c0_i32 = arith.constant 0 : i32
    %c0_i32_0 = arith.constant 0 : i32
    return %arg0, %c0_i32 : i32, i32
  }
  func.func @transform_1(%arg0: i32) -> (i32, i32) {
    %c0_i32 = arith.constant 0 : i32
    %c0_i32_0 = arith.constant 0 : i32
    %c0_i32_1 = arith.constant 0 : i32
    return %c0_i32, %c0_i32_0 : i32, i32
  }
  func.func @transform_2(%arg0: i32) -> (i32, i32) {
    %c0_i32 = arith.constant 0 : i32
    %c0_i32_0 = arith.constant 0 : i32
    %c0_i32_1 = arith.constant 0 : i32
    return %c0_i32, %c0_i32_0 : i32, i32
  }
  func.func @transform_3(%arg0: i32) -> (i32, i32) {
    %c0_i32 = arith.constant 0 : i32
    %c0_i32_0 = arith.constant 0 : i32
    %c0_i32_1 = arith.constant 0 : i32
    return %c0_i32, %c0_i32_0 : i32, i32
  }
  func.func @transform_4(%arg0: i32) -> (i32, i32) {
    %c0_i32 = arith.constant 0 : i32
    %c0_i32_0 = arith.constant 0 : i32
    %c0_i32_1 = arith.constant 0 : i32
    return %c0_i32, %c0_i32_0 : i32, i32
  }
  func.func @transform_5(%arg0: i32) -> (i32, i32) {
    %c0_i32 = arith.constant 0 : i32
    %c0_i32_0 = arith.constant 0 : i32
    %c0_i32_1 = arith.constant 0 : i32
    return %c0_i32, %c0_i32_0 : i32, i32
  }
  func.func @transform_6(%arg0: i32) -> (i32, i32) {
    %c0_i32 = arith.constant 0 : i32
    %c0_i32_0 = arith.constant 0 : i32
    %c0_i32_1 = arith.constant 0 : i32
    return %c0_i32, %c0_i32_0 : i32, i32
  }
  func.func @transform_7(%arg0: i32) -> (i32, i32) {
    %c0_i32 = arith.constant 0 : i32
    %c0_i32_0 = arith.constant 0 : i32
    %c0_i32_1 = arith.constant 0 : i32
    return %c0_i32, %c0_i32_0 : i32, i32
  }
  func.func @transform_8(%arg0: i32) -> (i32, i32) {
    %c0_i32 = arith.constant 0 : i32
    %c0_i32_0 = arith.constant 0 : i32
    %c0_i32_1 = arith.constant 0 : i32
    return %c0_i32, %c0_i32_0 : i32, i32
  }
  func.func @transform_9(%arg0: i32) -> (i32, i32) {
    %c0_i32 = arith.constant 0 : i32
    %c0_i32_0 = arith.constant 0 : i32
    return %c0_i32, %arg0 : i32, i32
  }
}

</mosaic_0001>

<bundles_post_ra>
// kernel: tpu_custom_call.1
= control target key start
LH: loop header
LB: loop body
LE: loop exit
PB: predicated region body
PF: predicated region fallthrough
CT: control target
= control target key end

     0   :  { %s1425_s0 = inlined_call_operand.vmem [shape: bf16[300,10], index: 0, kind: input, shape index: {}]   ;;  %s1426_s1 = inlined_call_operand.vmem [shape: bf16[32,10], index: 1, kind: input, shape index: {}]   ;;  %s1427_s2 = inlined_call_operand.vmem [shape: f32[32,1], index: 2, kind: input, shape index: {}]   ;;  %s1428_s3 = inlined_call_operand.vmem [shape: f32[16,32], index: 3, kind: input, shape index: {}]   ;;  %s1429_s4 = inlined_call_operand.vmem [shape: f32[16,1], index: 4, kind: input, shape index: {}]   ;;  %s1430_s5 = inlined_call_operand.vmem [shape: f32[8,16], index: 5, kind: input, shape index: {}]   ;;  %s1431_s6 = inlined_call_operand.vmem [shape: f32[8,1], index: 6, kind: input, shape index: {}]   ;;  %s1432_s7 = inlined_call_operand.vmem [shape: f32[1,8], index: 7, kind: input, shape index: {}]   ;;  %s1433_s8 = inlined_call_operand.<no memory space> [shape: f32[1,1], index: 8, kind: input, shape index: {}]   ;;  %s1434_s9 = inlined_call_operand.hbm [shape: f32[1,384], index: 9, kind: output, shape index: {}]  }
   0x1   :  { %v14_v0 = vstv %s1433_s8 }
   0x2   :  { %15 = vst [vmem:[#allocation2] sm:$0x1] %v14_v0 }
   0x3   :  { %v1140_v1 = vld [vmem:[%s1425_s0 + $0x40] sm:$0xff]   ;;  %vm242_vm0 = vcmask 80896   ;;  %v1190_v4 = vmov 0   ;;  %v1143_v6 = vld [vmem:[%s1425_s0 + $0x48] sm:$0xff]   ;;  %v1147_v11 = vld [vmem:[%s1425_s0 + $0x90] sm:$0xff]  }
   0x4   :  { %v1141_v2 = vld [vmem:[%s1425_s0 + $0x80] sm:$0xff]   ;;  %1116 = vmatprep.subr.msk.bf16.mxu0 %vm242_vm0, %v1140_v1  ;;  %1138 = vset.pattern.permute.xlu0 %v1190_v4  ;;  %v1144_v8 = vld [vmem:[%s1425_s0 + $0x88] sm:$0xff]   ;;  %v1146_v13 = vld [vmem:[%s1425_s0 + $0x50] sm:$0xff]   ;;  %v304_v15 = vsel %vm242_vm0, %v1147_v11, 0 }
   0x5   :  { %v1142_v3 = vld [vmem:[%s1425_s0] sm:$0xff]   ;;  %1124 = vmatprep.subr.msk.bf16.mxu1 %vm242_vm0, %v1141_v2  ;;  %v298_v5 = vsel %vm242_vm0, %v1141_v2, 0  ;;  %1139 = vset.pattern.permute.xlu1 %v1190_v4  ;;  %v1145_v9 = vld [vmem:[%s1425_s0 + $0x8] sm:$0xff]   ;;  %v301_v10 = vsel %vm242_vm0, %v1144_v8, 0  ;;  %v1148_v14 = vld [vmem:[%s1425_s0 + $0x10] sm:$0xff]  }
   0x6   :  { %v250_v7 = vsel %vm242_vm0, %v1142_v3, 0  ;;  %1051 = vmatpush3.bf16.xpose.msra.mxu1 %v298_v5  ;;  %v253_v12 = vsel %vm242_vm0, %v1145_v9, 0  ;;  %v1150_v16 = vld [vmem:[%s1425_s0 + $0x98] sm:$0xff]   ;;  %v256_v17 = vsel %vm242_vm0, %v1148_v14, 0  ;;  %v1164_v20 = vld [vmem:[%s1426_s1] sm:$0xff]   ;;  %v90_v26 = vld [vmem:[%s1427_s2 + $0x10] sm:$0xff] }
   0x7   :  { %1010 = vmatpush3.bf16.xpose.msra.mxu0 %v250_v7  ;;  %1125 = vmatprep.subr.msk.bf16.mxu1 %vm242_vm0, %v1144_v8  ;;  %v1149_v18 = vld [vmem:[%s1425_s0 + $0x58] sm:$0xff]   ;;  %v307_v21 = vsel %vm242_vm0, %v1150_v16, 0  ;;  %v1153_v22 = vld [vmem:[%s1425_s0 + $0xa0] sm:$0xff]   ;;  %v89_v27 = vld [vmem:[%s1427_s2 + $0x8] sm:$0xff] }
   0x8   :  { %1117 = vmatprep.subr.msk.bf16.mxu0 %vm242_vm0, %v1143_v6  ;;  %v1151_v19 = vld [vmem:[%s1425_s0 + $0x18] sm:$0xff]   ;;  %v1152_v24 = vld [vmem:[%s1425_s0 + $0x60] sm:$0xff]   ;;  %1025 = vmatprep.mubr.msk.bf16.mxu0 %vm242_vm0, %v1164_v20 }
   0x9   :  { %v259_v23 = vsel %vm242_vm0, %v1151_v19, 0  ;;  %1066 = vmatprep.mubr.msk.bf16.mxu1 %vm242_vm0, %v1164_v20  ;;  %v88_v25 = vld [vmem:[%s1427_s2] sm:$0xff]  ;;  %104 = vperm.xlu1 %1139, %v90_v26   ;;  %v91_v28 = vld [vmem:[%s1427_s2 + $0x18] sm:$0xff] }
   0xa   :  { %94 = vperm.xlu0 %1138, %v88_v25  }
   0xe   :  { %1053 = vmatpush3.bf16.xpose.msra.mxu1 %v301_v10 }
   0xf   :  { %1012 = vmatpush3.bf16.xpose.msra.mxu0 %v253_v12  ;;  %1126 = vmatprep.subr.msk.bf16.mxu1 %vm242_vm0, %v1147_v11 }
  0x10   :  { %1118 = vmatprep.subr.msk.bf16.mxu0 %vm242_vm0, %v1146_v13 }
  0x16   :  { %1055 = vmatpush3.bf16.xpose.msra.mxu1 %v304_v15 }
  0x17   :  { %1014 = vmatpush3.bf16.xpose.msra.mxu0 %v256_v17  ;;  %1127 = vmatprep.subr.msk.bf16.mxu1 %vm242_vm0, %v1150_v16 }
  0x18   :  { %1119 = vmatprep.subr.msk.bf16.mxu0 %vm242_vm0, %v1149_v18 }
  0x1e   :  { %1057 = vmatpush3.bf16.xpose.msra.mxu1 %v307_v21 }
  0x1f   :  { %16 = vsyncpa [#allocation4], 0  ;;  %1016 = vmatpush3.bf16.xpose.msra.mxu0 %v259_v23  ;;  %1128 = vmatprep.subr.msk.bf16.mxu1 %vm242_vm0, %v1153_v22  ;;  %v1154_v29 = vld [vmem:[%s1425_s0 + $0x20] sm:$0xff]   ;;  %v438_v31 = vld [vmem:[%s1429_s4 + $0x8] sm:$0xff]  ;;  %v310_v32 = vsel %vm242_vm0, %v1153_v22, 0  ;;  %vm449_vm1 = vcmask 261120  }
  0x20   :  { %1120 = vmatprep.subr.msk.bf16.mxu0 %vm242_vm0, %v1152_v24  ;;  %99 = vperm.xlu0 %1138, %v89_v27   ;;  %v437_v30 = vld [vmem:[%s1429_s4] sm:$0xff]  ;;  %v1156_v33 = vld [vmem:[%s1425_s0 + $0xa8] sm:$0xff]   ;;  %v262_v34 = vsel %vm242_vm0, %v1154_v29, 0  ;;  %v1159_v40 = vld [vmem:[%s1425_s0 + $0xb0] sm:$0xff]   ;;  %v1191_v53 = vmov 0.0   ;;  %vm1193_vm2 = vmmov 0  }
  0x21   :  { %109 = vperm.xlu1 %1139, %v91_v28   ;;  %v1155_v35 = vld [vmem:[%s1425_s0 + $0x68] sm:$0xff]   ;;  %v615_v36 = vld [vmem:[%s1431_s6] sm:$0xff]  ;;  %v313_v39 = vsel %vm242_vm0, %v1156_v33, 0  ;;  %v1158_v42 = vld [vmem:[%s1425_s0 + $0x70] sm:$0xff]   ;;  %v316_v44 = vsel %vm242_vm0, %v1159_v40, 0  ;;  %vm621_vm3 = vcmask 130048  }
  0x22   :  { %v770_v37 = vld [vmem:[#allocation2] sm:$0x1]  ;;  %v1157_v38 = vld [vmem:[%s1425_s0 + $0x28] sm:$0xff]   ;;  %v1160_v43 = vld [vmem:[%s1425_s0 + $0x30] sm:$0xff]   ;;  %vm780_vm4 = vcmask 64512  }
  0x23   :  { %v265_v41 = vsel %vm242_vm0, %v1157_v38, 0  ;;  %v1162_v45 = vld [vmem:[%s1425_s0 + $0xb8] sm:$0xff]   ;;  %v268_v46 = vsel %vm242_vm0, %v1160_v43, 0  ;;  %v1165_v51 = vld [vmem:[%s1426_s1 + $0x8] sm:$0xff]   ;;  %v435_v52 = vld [vmem:[%s1428_s3] sm:$0xff] }
  0x24   :  { %441 = vperm.xlu0 %1138, %v437_v30   ;;  %v1161_v47 = vld [vmem:[%s1425_s0 + $0x78] sm:$0xff]   ;;  %v319_v49 = vsel %vm242_vm0, %v1162_v45, 0 }
  0x25   :  { %446 = vperm.xlu1 %1139, %v438_v31   ;;  %v1163_v48 = vld [vmem:[%s1425_s0 + $0x38] sm:$0xff]  }
  0x26   :  { %1059 = vmatpush3.bf16.xpose.msra.mxu1 %v310_v32  ;;  %v271_v50 = vsel %vm242_vm0, %v1163_v48, 0 }
  0x27   :  { %1018 = vmatpush3.bf16.xpose.msra.mxu0 %v262_v34  ;;  %1129 = vmatprep.subr.msk.bf16.mxu1 %vm242_vm0, %v1156_v33  ;;  %v436_v34 = vld [vmem:[%s1428_s3 + $0x8] sm:$0xff] }
  0x28   :  { %1121 = vmatprep.subr.msk.bf16.mxu0 %vm242_vm0, %v1155_v35  ;;  %618 = vperm.xlu0 %1138, %v615_v36  }
  0x29   :  { %773 = vperm.xlu1 %1139, %v770_v37   ;;  %v1192_v37 = vmov 0.0|0.0  }
  0x2e   :  { %1061 = vmatpush3.bf16.xpose.msra.mxu1 %v313_v39 }
  0x2f   :  { %1020 = vmatpush3.bf16.xpose.msra.mxu0 %v265_v41  ;;  %1130 = vmatprep.subr.msk.bf16.mxu1 %vm242_vm0, %v1159_v40 }
  0x30   :  { %1122 = vmatprep.subr.msk.bf16.mxu0 %vm242_vm0, %v1158_v42 }
  0x36   :  { %1063 = vmatpush3.bf16.xpose.msra.mxu1 %v316_v44 }
  0x37   :  { %1022 = vmatpush3.bf16.xpose.msra.mxu0 %v268_v46  ;;  %1131 = vmatprep.subr.msk.bf16.mxu1 %vm242_vm0, %v1162_v45 }
  0x38   :  { %1123 = vmatprep.subr.msk.bf16.mxu0 %vm242_vm0, %v1161_v47 }
  0x3e   :  { %1065 = vmatpush3.bf16.xpose.msra.mxu1 %v319_v49 }
  0x3f   :  { %1024 = vmatpush3.bf16.xpose.msra.mxu0 %v271_v50  ;;  %v614_v50 = vld [vmem:[%s1430_s5] sm:$0xff] }
  0x45   :  { %1067 = vmatmul.mubr.msk.bf16.vlgmr.msra.gmra.mrb[0].mxu1 %vm242_vm0, %v1165_v51 }
  0x46   :  { %1026 = vmatmul.mubr.msk.bf16.vlgmr.msra.gmra.mrb[0].mxu0 %vm242_vm0, %v1164_v20  ;;  %520 = vmatprep.mubr.f32.mxu1 %v1191_v53 }
  0x47   :  { %1027 = vmatprep.mubr.msk.bf16.mxu0 %vm242_vm0, %v1165_v51 }
  0x4e   :  { %1028 = vmatmul.mubr.msk.bf16.gmra.mrb[4].mxu0 %vm242_vm0, %v1165_v51 }
  0x4f   :  { %1078 = vmatprep.mubr.msk.f32.mxu0 %vm449_vm1, %v435_v52 }
  0x88   :  { %v105_v55 = vpop.permute.xlu1 %104 }
  0x89   :  { %v95_v54 = vpop.permute.xlu0 %94 }
  0x9f   :  { %v100_v56 = vpop.permute.xlu0 %99 }
  0xa0   :  { %v110_v57 = vpop.permute.xlu1 %109 }
  0xa3   :  { %v442_v40 = vpop.permute.xlu0 %441 }
  0xa4   :  { %v447_v38 = vpop.permute.xlu1 %446 }
 0x118   :  { %v1068_v58 = vpop.f32.mrb[0].mxu1 }
 0x119   :  { %v355_v59 = vpop.f32.mrb[0].mxu0  ;;  %v417_v60 = vadd.f32 %v1068_v58, %v105_v55  ;;  %v408_v61 = vpop.f32.mrb[1].mxu1 }
 0x11a   :  { %v356_v62 = vadd.f32 %v355_v59, %v95_v54  ;;  %v357_v63 = vpop.f32.mrb[1].mxu0  ;;  %v409_v0 = vadd.f32 %v408_v61, %v95_v54  ;;  %v1069_v1 = vpop.f32.mrb[2].mxu1 }
 0x11b   :  { %v431_v2 = vmax.f32 %v417_v60, 0.0  ;;  %v358_v3 = vadd.f32 %v357_v63, %v95_v54  ;;  %v359_v4 = vpop.f32.mrb[2].mxu0  ;;  %v420_v5 = vadd.f32 %v1069_v1, %v110_v57  ;;  %v411_v6 = vpop.f32.mrb[3].mxu1 }
 0x11c   :  { %v425_v7 = vmax.f32 %v409_v0, 0.0  ;;  %v360_v8 = vadd.f32 %v359_v4, %v100_v56  ;;  %v361_v9 = vpop.f32.mrb[3].mxu0  ;;  %v412_v10 = vadd.f32 %v411_v6, %v100_v56  ;;  %v423_v13 = vmax.f32 %v356_v62, 0.0  ;;  %v619_v63 = vpop.permute.xlu0 %618  ;;  %v769_v4 = vld [vmem:[%s1432_s7] sm:$0x1]  ;;  %s1195_s7 = smov [#allocation3]  }
 0x11d   :  { %v434_v11 = vmax.f32 %v420_v5, 0.0  ;;  %v362_v12 = vadd.f32 %v361_v9, %v100_v56  ;;  %v424_v16 = vmax.f32 %v358_v3, 0.0  ;;  %s963_s11 = sshll.u32 %s1195_s7, 4  ;;  %s964_s11 = int_to_ptr.vmem [resolvable:$true] %s963_s11 }
 0x11e   :  { %v426_v14 = vmax.f32 %v360_v8, 0.0  ;;  %v428_v15 = vmax.f32 %v412_v10, 0.0  ;;  %s1166_s12 = scalar_lea.vmem %s964_s11, 48  ;;  %s1170_s13 = scalar_lea.vmem %s964_s11, 64 }
 0x11f   :  { %v1105_v17 = vpack.c.bf16 %v434_v11, %v431_v2  ;;  %v427_v18 = vmax.f32 %v362_v12, 0.0  ;;  %p1167_p0 = scmp.ne.s32.totalorder %s964_s11, %s1166_s12  ;;  %p1171_p1 = scmp.lt.s32.totalorder %s964_s11, %s964_s11 }
 0x120   :  { %v1095_v19 = vpack.c.bf16 %v426_v14, %v423_v13  ;;  %v1101_v20 = vpack.c.bf16 %v428_v15, %v425_v7  ;;  %v1194_v14 = vmov 1966171168   ;;  %p1172_p2 = scmp.lt.s32.totalorder %s1170_s13, %s1166_s12 }
 0x121   :  { %v1093_v21 = vpack.c.bf16 %v427_v18, %v424_v16  ;;  %v365_v22 = vpop.f32.mrb[4].mxu0  ;;  %v930_v15 = vunpack.c.l.s4 %v1194_v14 }
 0x122   :  { %v366_v23 = vadd.f32 %v365_v22, %v105_v55  ;;  %v367_v24 = vpop.f32.mrb[5].mxu0  ;;  %1102 = vmatprep.subr.bf16.mxu0 %v1101_v20  ;;  %p1173_p3 = por %p1172_p2, %p1171_p1 }
 0x123   :  { %v368_v25 = vadd.f32 %v367_v24, %v105_v55  ;;  %v369_v26 = vpop.f32.mrb[6].mxu0  ;;  %1094 = vmatprep.subr.bf16.mxu1 %v1093_v21  ;;  %1104 = vmatpush3.bf16.msra.mxu0 %v1101_v20  ;;  %v931_v18 = vunpack.c.0.s8 %v930_v15 }
 0x124   :  { %v370_v27 = vadd.f32 %v369_v26, %v110_v57  ;;  %v371_v28 = vpop.f32.mrb[7].mxu0  ;;  %1096 = vmatpush1.bf16.msra.mxu1 %v1095_v19  ;;  %1106 = vmatprep.subr.bf16.mxu0 %v1105_v17  ;;  %v429_v30 = vmax.f32 %v366_v23, 0.0  ;;  %p1174_p4 = pnand %p1173_p3, %p1167_p0 }
 0x125   :  { %v372_v29 = vadd.f32 %v371_v28, %v110_v57  ;;  %v430_v32 = vmax.f32 %v368_v25, 0.0 }
 0x126   :  { %v432_v31 = vmax.f32 %v370_v27, 0.0 }
 0x127   :  { %v433_v33 = vmax.f32 %v372_v29, 0.0  ;;  %1108 = vmatpush3.bf16.msra.mxu0 %v1105_v17  ;;  %v774_v17 = vpop.permute.xlu1 %773 }
 0x128   :  { %v1099_v35 = vpack.c.bf16 %v432_v31, %v429_v30  ;;  %1113 = vmatprep.subr.bf16.mxu0 %v1192_v37 }
 0x129   :  { %v1097_v36 = vpack.c.bf16 %v433_v33, %v430_v32 }
 0x12a   :  { %1079 = vmatmul.mubr.msk.f32.vlgmr.msra.gmra.mrb[8].mxu0 %vm449_vm1, %v436_v34 }
 0x12b   :  { %1098 = vmatprep.subr.bf16.mxu1 %v1097_v36  ;;  %1085 = vmatprep.mubr.msk.f32.mxu0 %vm1193_vm2, %v1191_v53 }
 0x12c   :  { %1100 = vmatpush1.bf16.msra.mxu1 %v1099_v35 }
 0x12f   :  { %1001 = vmatmul.mubr.msk.f32.vlgmr.msra.gmra.mrb[4].mxu1 %vm449_vm1, %v435_v52 }
 0x130   :  { %526 = vmatprep.mubr.f32.mxu1 %v1191_v53 }
 0x133   :  { %1002 = vmatmul.mubr.msk.f32.gmra.mrb[6].mxu1 %vm449_vm1, %v436_v34 }
 0x134   :  { %689 = vmatprep.mubr.f32.mxu1 %v1191_v53 }
 0x1fd   :  { %v1080_v39 = vpop.f32.mrb[8].mxu0 }
 0x1fe   :  { %v605_v41 = vadd.f32 %v1080_v39, %v447_v38  ;;  %v599_v42 = vpop.f32.mrb[9].mxu0 }
 0x1ff   :  { %v600_v43 = vadd.f32 %v599_v42, %v442_v40 }
 0x200   :  { %v613_v44 = vmax.f32 %v605_v41, 0.0 }
 0x201   :  { %v610_v45 = vmax.f32 %v600_v43, 0.0 }
 0x202   :  { %v522_v46 = vpop.f32.mrb[4].mxu1 }
 0x203   :  { %v1114_v47 = vpack.c.bf16 %v613_v44, %v610_v45  ;;  %v524_v48 = vpop.f32.mrb[5].mxu1  ;;  %v523_v49 = vadd.f32 %v522_v46, %v442_v40 }
 0x204   :  { %v525_v51 = vadd.f32 %v524_v48, %v442_v40 }
 0x205   :  { %1115 = vmatpush3.bf16.msra.mxu0 %v1114_v47  ;;  %v608_v57 = vmax.f32 %v523_v49, 0.0 }
 0x206   :  { %v528_v52 = vpop.f32.mrb[6].mxu1  ;;  %1088 = vmatprep.subr.mxu0 %v1191_v53  ;;  %v609_v59 = vmax.f32 %v525_v51, 0.0 }
 0x207   :  { %v529_v54 = vadd.f32 %v528_v52, %v447_v38  ;;  %v530_v55 = vpop.f32.mrb[7].mxu1 }
 0x208   :  { %v531_v56 = vadd.f32 %v530_v55, %v447_v38  ;;  %1086 = vmatmul.mubr.msk.f32.vlgmr.msra.gmra.mrb[10].mxu0 %vm621_vm3, %v614_v50 }
 0x209   :  { %v611_v58 = vmax.f32 %v529_v54, 0.0  ;;  %1090 = vmatprep.mubr.msk.f32.mxu0 %vm1193_vm2, %v1191_v53 }
 0x20a   :  { %v612_v60 = vmax.f32 %v531_v56, 0.0 }
 0x20b   :  { %v1111_v61 = vpack.c.bf16 %v611_v58, %v608_v57 }
 0x20c   :  { %v1109_v62 = vpack.c.bf16 %v612_v60, %v609_v59 }
 0x20e   :  { %1110 = vmatprep.subr.bf16.mxu1 %v1109_v62 }
 0x20f   :  { %1112 = vmatpush1.bf16.msra.mxu1 %v1111_v61 }
 0x212   :  { %1005 = vmatmul.mubr.msk.f32.vlgmr.msra.gmra.mrb[8].mxu1 %vm621_vm3, %v614_v50 }
 0x213   :  { %848 = vmatprep.mubr.f32.mxu1 %v1191_v53  ;;  %v776_v53 = vlaneseq }
 0x215   :  { %v777_v13 = vshrl.u32 %v776_v53, 7  ;;  %vm954_vm5 = vcmp.lt.s32.totalorder %v776_v53, 384 }
 0x217   :  { %v778_v16 = vsub.s32 0, %v777_v13  ;;  %v934_v23 = vsub.s32 %v931_v18, %v777_v13 }
 0x219   :  { %v779_v19 = vrot.slane %v774_v17, %v778_v16 }
 0x2db   :  { %v762_v0 = vpop.f32.mrb[10].mxu0 }
 0x2dc   :  { %v763_v1 = vadd.f32 %v762_v0, %v619_v63  ;;  %v1087_v2 = vpop.f32.mrb[11].mxu0 }
 0x2de   :  { %v768_v3 = vmax.f32 %v763_v1, 0.0 }
 0x2e0   :  { %1089 = vmatpush3.msra.mxu0 %v768_v3 }
 0x2e1   :  { %1091 = vmatmul.mubr.msk.f32.vlgmr.msra.gmra.mrb[12].mxu0 %vm780_vm4, %v769_v4 }
 0x2e5   :  { %v691_v5 = vpop.f32.mrb[8].mxu1 }
 0x2e6   :  { %v692_v6 = vadd.f32 %v691_v5, %v619_v63  ;;  %v693_v7 = vpop.f32.mrb[9].mxu1 }
 0x2e7   :  { %v694_v8 = vadd.f32 %v693_v7, %v619_v63 }
 0x2e8   :  { %v766_v10 = vmax.f32 %v692_v6, 0.0 }
 0x2e9   :  { %v767_v9 = vmax.f32 %v694_v8, 0.0 }
 0x2eb   :  { %784 = vmatprep.subr.mxu1 %v767_v9 }
 0x2ec   :  { %785 = vmatpush1.msra.mxu1 %v766_v10 }
 0x2ed   :  { %1007 = vmatmul.mubr.msk.f32.vlgmr.msra.gmra.mrb[10].mxu1 %vm780_vm4, %v769_v4 }
 0x3b4   :  { %v921_v11 = vpop.f32.mrb[12].mxu0 }
 0x3b5   :  { %v1092_v12 = vpop.f32.mrb[13].mxu0  ;;  %v922_v24 = vadd.f32 %v921_v11, %v779_v19 }
 0x3b7   :  { %v942_v27 = vrot.slane %v922_v24, %v934_v23 }
 0x3c0   :  { %v850_v20 = vpop.f32.mrb[10].mxu1 }
 0x3c1   :  { %v851_v21 = vadd.f32 %v850_v20, %v779_v19  ;;  %v852_v22 = vpop.f32.mrb[11].mxu1 }
 0x3c2   :  { %v853_v25 = vadd.f32 %v852_v22, %v779_v19 }
 0x3c4   :  { %v928_v26 = vcombine.low %v851_v21, %v853_v25 }
 0x3c6   :  { %v935_v28 = vrot.slane %v928_v26, %v934_v23 }
 0x3c8   :  { %v943_v29 = vcombine.low %v935_v28, %v942_v27 }
 0x3ca   :  { %v950_v30 = vrot.slane %v943_v29, %v934_v23 }
 0x3cc   :  { %956 = vst.msk [vmem:[#allocation3] sm:$0x7] %vm954_vm5, %v950_v30 }
 0x3cd   :  { %1177 = shalt.err (!%p1174_p4)
}
 0x3ce   :  { %s1178_s4 = scalar_lea.hbm %s1434_s9, 48 }
 0x3cf   :  { %p1179_p5 = scmp.ne.s32.totalorder %s1434_s9, %s1178_s4  ;;  %p1182_p6 = scmp.lt.u32.totalorder %s1178_s4, %s1434_s9 }
 0x3d1   :  { %p1184_p7 = pnand %p1182_p6, %p1179_p5 }
 0x3d3   :  { %1187 = shalt.err (!%p1184_p7)
}
 0x3d4   :  { %966 = dma.vmem_to_hbm [thread:$0]  %s964_s11, 48, %s1434_s9, [#allocation4]  }
 0x3d5   :  { %1188 = dma.done.wait [#allocation4], 48  }
 0x3d6   :  { %1189 = vsyncadd [#allocation4], 4294967248 }
 0x3d7   :  { %970 = vsyncpa [#allocation4], 1 }

</bundles_post_ra>
